<compile_context>
chip_gen: v6e
topology: v6e:2x2x1
jax: 0.10.0
libtpu: 0.0.40
codegen_flags: <defaults>
</compile_context>

<pallas_src>
import functools
import math

import jax
import jax.numpy as jnp
from jax.experimental import pallas as pl
from jax.experimental.pallas import tpu as pltpu

SMOOTH = 1e-5


def _fold(a, fold):
    """Reduce an (S, 128) f32 slab to (fold, 128) partial sums.

    For fold == 8 and S a multiple of 8 this uses only element-wise adds of
    sublane-tile-aligned slabs (pure VPU, no cross-lane/sublane XLU work).
    """
    s = a.shape[0]
    if s == fold:
        return a
    if fold == 1 or s % fold != 0:
        # Only reachable in the single-tile case (runs once per batch element).
        return jnp.sum(a, axis=0, keepdims=True)
    n = s // fold
    if n % 2 == 0:
        h = s // 2
        return _fold(a[:h] + a[h:], fold)
    return _fold(a[: s - fold], fold) + a[s - fold:]


def _loss_kernel(*refs, has_mask, fold):
    """One (batch, pixel-tile) grid step.

    refs (has_mask=True):  x_ref (C,S,128), lbl_ref (S,128) i32, msk_ref (S,128) f32,
                           out_ref (3C+2, 1) f32, acc_ref (3C+2, fold, 128) f32 scratch
    refs (has_mask=False): x_ref, lbl_ref, out_ref (3C+1, 1), acc_ref (3C+1, fold, 128)

    acc rows: [I_0, Y_0, Z_0, ..., I_{C-1}, Y_{C-1}, Z_{C-1}, sum(ce*w) (, sum(w))]
    """
    if has_mask:
        x_ref, lbl_ref, msk_ref, out_ref, acc_ref = refs
    else:
        x_ref, lbl_ref, out_ref, acc_ref = refs
        msk_ref = None

    ti = pl.program_id(1)
    C = x_ref.shape[0]

    @pl.when(ti == 0)
    def _():
        acc_ref[...] = jnp.zeros(acc_ref.shape, acc_ref.dtype)

    lbl = lbl_ref[...]                                           # (S, 128) int32
    w = msk_ref[...].astype(jnp.float32) if has_mask else None   # (S, 128) or None
    xs = [x_ref[c].astype(jnp.float32) for c in range(C)]        # C x (S, 128)

    # Numerically-stable softmax over classes: element-wise max / sum of C slabs.
    mval = xs[0]
    for c in range(1, C):
        mval = jnp.maximum(mval, xs[c])
    exs = [jnp.exp(xc - mval) for xc in xs]                      # EUP
    se = exs[0]
    for c in range(1, C):
        se = se + exs[c]
    inv = pl.reciprocal(se, approx=True)                         # EUP vrcp; ~2^-12 rel err
    ps = [e * inv for e in exs]

    # Per-pixel cross entropy: logsumexp(x) - x[label]  (select chain, no XLU).
    onehot = [lbl == c for c in range(C)]
    picked = jnp.where(onehot[0], xs[0], 0.0)
    for c in range(1, C):
        picked = jnp.where(onehot[c], xs[c], picked)
    ce_pix = (mval - picked) + jnp.log(se)                       # (S, 128)

    # Per-class dice partial sums -> persistent VMEM accumulator (element-wise folds).
    for c in range(C):
        pm_c = ps[c] * w if has_mask else ps[c]                  # reused for I and Z
        i_c = jnp.where(onehot[c], pm_c, 0.0)
        y_c = jnp.where(onehot[c], w, 0.0) if has_mask else onehot[c].astype(jnp.float32)
        z_c = pm_c * ps[c]
        acc_ref[3 * c + 0] += _fold(i_c, fold)
        acc_ref[3 * c + 1] += _fold(y_c, fold)
        acc_ref[3 * c + 2] += _fold(z_c, fold)

    ce_t = ce_pix * w if has_mask else ce_pix
    acc_ref[3 * C + 0] += _fold(ce_t, fold)
    if has_mask:
        acc_ref[3 * C + 1] += _fold(w, fold)

    # Single cross-lane reduction + narrow store, only on the last pixel tile.
    @pl.when(ti == pl.num_programs(1) - 1)
    def _():
        acc = acc_ref[...]                                       # (NACC, fold, 128)
        lane = jnp.sum(acc, axis=2)                              # (NACC, fold)
        out_ref[...] = jnp.sum(lane, axis=1, keepdims=True)      # (NACC, 1)


def _build_call(B, C, s, n_tiles, fold, has_mask):
    nacc = 3 * C + (2 if has_mask else 1)
    kernel = functools.partial(_loss_kernel, has_mask=has_mask, fold=fold)

    x_spec = pl.BlockSpec((None, C, s, 128), lambda b, i: (b, 0, i, 0))
    side_spec = pl.BlockSpec((None, s, 128), lambda b, i: (b, i, 0))
    in_specs = [x_spec, side_spec] + ([side_spec] if has_mask else [])

    return pl.pallas_call(
        kernel,
        out_shape=jax.ShapeDtypeStruct((B, nacc, 1), jnp.float32),
        grid_spec=pltpu.PrefetchScalarGridSpec(
            num_scalar_prefetch=0,
            grid=(B, n_tiles),
            in_specs=in_specs,
            out_specs=pl.BlockSpec((None, nacc, 1), lambda b, i: (b, 0, 0)),
            scratch_shapes=[pltpu.VMEM((nacc, fold, 128), jnp.float32)],
        ),
        compiler_params=pltpu.CompilerParams(
            dimension_semantics=("parallel", "arbitrary"),
            vmem_limit_bytes=32 * 1024 * 1024,
        ),
    )


@functools.partial(jax.jit, static_argnames=("s", "n_tiles", "fold"))
def _co_training_loss_impl(model_out, label, mask, *, s, n_tiles, fold):
    B, C = model_out.shape[0], model_out.shape[1]
    HW = math.prod(model_out.shape[2:])
    S_pad = s * n_tiles
    HW_pad = S_pad * 128

    x = model_out.reshape(B, C, HW)                 # keep incoming dtype (bf16 stays bf16)
    lbl = label.reshape(B, HW).astype(jnp.int32)
    msk = None if mask is None else mask.reshape(B, HW).astype(jnp.float32)

    if HW_pad != HW:                                # odd sizes only; aligned sizes skip this
        pad = HW_pad - HW
        x = jnp.pad(x, ((0, 0), (0, 0), (0, pad)))
        lbl = jnp.pad(lbl, ((0, 0), (0, pad)))
        if msk is None:
            # Drop padded pixels via the masked path; sum(mask) == B*HW keeps CE a plain mean.
            valid = (jnp.arange(HW_pad, dtype=jnp.int32) < HW).astype(jnp.float32)
            msk = jnp.broadcast_to(valid[None, :], (B, HW_pad))
        else:
            msk = jnp.pad(msk, ((0, 0), (0, pad)))

    has_mask = msk is not None
    x = x.reshape(B, C, S_pad, 128)
    lbl = lbl.reshape(B, S_pad, 128)
    call = _build_call(B, C, s, n_tiles, fold, has_mask)
    if has_mask:
        sums = call(x, lbl, msk.reshape(B, S_pad, 128))
    else:
        sums = call(x, lbl)

    tot = jnp.sum(sums, axis=0)[:, 0]               # (NACC,) reduce over batch
    inter = tot[0:3 * C:3]
    y_sum = tot[1:3 * C:3]
    z_sum = tot[2:3 * C:3]
    dice = jnp.mean(1.0 - (2.0 * inter + SMOOTH) / (z_sum + y_sum + SMOOTH))
    denom = tot[3 * C + 1] if has_mask else jnp.float32(B * HW)
    ce = tot[3 * C] / denom
    return 0.5 * (ce + dice)


def _choose_tiles(s_total, s_max):
    """Pick (sublane-rows per tile, #tiles).  Multi-tile S is a multiple of 8; an exact
    divisor of s_total is preferred so no padding / ragged handling is ever needed."""
    if s_total <= s_max:
        return s_total, 1
    base = max(8, (s_max // 8) * 8)
    if s_total % 8 == 0:
        s = base
        while s >= 8:
            if s_total % s == 0:
                return s, s_total // s
            s -= 8
    n = -(-s_total // base)
    s = ((-(-s_total // n) + 7) // 8) * 8           # balanced tile, minimal padding
    return s, -(-s_total // s)


def co_training_loss(model_out, label, mask=None, max_sublanes=None):
    """model_out: (B, C, H, W) logits; label: (B, H, W) [or (B,1,H,W)] integer classes;
    mask: (B, H, W) / None.  Returns the scalar co-training loss."""
    B, C = int(model_out.shape[0]), int(model_out.shape[1])
    HW = int(math.prod(model_out.shape[2:]))
    s_total = -(-HW // 128)                          # rows of 128 pixels
    if max_sublanes is None:
        # ~<= 1 MiB f32 logits block: 512 rows (65536 px) for C<=4, scaled down for larger C.
        max_sublanes = max(32, min(512, ((2048 // max(C, 1)) // 32) * 32))
    s, n_tiles = _choose_tiles(s_total, max_sublanes)
    fold = 8 if s % 8 == 0 else (s if s < 8 else 1)
    return _co_training_loss_impl(model_out, label, mask, s=s, n_tiles=n_tiles, fold=fold)


def _reference_loss(model_out, label, mask=None):
    """Pure-JAX reference mirroring the PyTorch module."""
    B, C = model_out.shape[0], model_out.shape[1]
    spatial = model_out.shape[2:]
    logits = model_out.astype(jnp.float32)
    logp = jax.nn.log_softmax(logits, axis=1)
    p = jnp.exp(logp)
    lbl = label.reshape((B,) + tuple(spatial))
    onehot = jax.nn.one_hot(lbl, C, axis=1, dtype=jnp.float32)        # (B, C, H, W)
    ce_pix = -jnp.sum(onehot * logp, axis=1)                          # (B, H, W)
    m = jnp.ones_like(ce_pix) if mask is None else mask.reshape(ce_pix.shape).astype(jnp.float32)
    ce = jnp.sum(ce_pix * m) / jnp.sum(m)
    mw = m[:, None]                                                   # (B, 1, H, W)
    inter = jnp.sum(p * onehot * mw, axis=(0, 2, 3))
    y = jnp.sum(onehot * mw, axis=(0, 2, 3))
    z = jnp.sum(p * p * mw, axis=(0, 2, 3))
    dice = jnp.mean(1.0 - (2.0 * inter + SMOOTH) / (z + y + SMOOTH))
    return 0.5 * (ce + dice)


if __name__ == "__main__":
    # approx reciprocal (EUP vrcp) adds ~2^-12 relative error to p; loosen tolerance a bit.
    RTOL, ATOL = 1e-3, 1e-3

    def _check(name, out, ref):
        assert jnp.isfinite(out), (name, out)
        assert jnp.allclose(out, ref, rtol=RTOL, atol=ATOL), (name, float(out), float(ref))

    B, C = 2, 4

    # 1) single tile per image (H*W = 256 -> S = 2), unmasked and masked
    k1, k2, k3 = jax.random.split(jax.random.PRNGKey(0), 3)
    H, W = 16, 16
    mo = jax.random.normal(k1, (B, C, H, W), dtype=jnp.float32)
    lb = jax.random.randint(k2, (B, H, W), 0, C, dtype=jnp.int32)
    mk = (jax.random.uniform(k3, (B, H, W)) > 0.5).astype(jnp.float32)
    out = co_training_loss(mo, lb)
    jax.block_until_ready(out)
    _check("single/unmasked", out, _reference_loss(mo, lb))
    out = co_training_loss(mo, lb, mk)
    jax.block_until_ready(out)
    _check("single/masked", out, _reference_loss(mo, lb, mk))

    # 2) multi-tile, exactly-tiled pixel axis (H*W = 2048, forced 8-row tiles)
    k1, k2, k3 = jax.random.split(jax.random.PRNGKey(1), 3)
    H, W = 32, 64
    mo = jax.random.normal(k1, (B, C, H, W), dtype=jnp.float32)
    lb = jax.random.randint(k2, (B, H, W), 0, C, dtype=jnp.int32)
    mk = (jax.random.uniform(k3, (B, H, W)) > 0.5).astype(jnp.float32)
    out = co_training_loss(mo, lb, max_sublanes=8)
    jax.block_until_ready(out)
    _check("multi/unmasked", out, _reference_loss(mo, lb))
    out = co_training_loss(mo, lb, mk, max_sublanes=8)
    jax.block_until_ready(out)
    _check("multi/masked", out, _reference_loss(mo, lb, mk))

    # 3) multi-tile with a padded (ragged) pixel count (H*W = 1089)
    k1, k2, k3 = jax.random.split(jax.random.PRNGKey(2), 3)
    H, W = 33, 33
    mo = jax.random.normal(k1, (B, C, H, W), dtype=jnp.float32)
    lb = jax.random.randint(k2, (B, H, W), 0, C, dtype=jnp.int32)
    mk = (jax.random.uniform(k3, (B, H, W)) > 0.5).astype(jnp.float32)
    out = co_training_loss(mo, lb, max_sublanes=8)
    jax.block_until_ready(out)
    _check("ragged/unmasked", out, _reference_loss(mo, lb))
    out = co_training_loss(mo, lb, mk, max_sublanes=8)
    jax.block_until_ready(out)
    _check("ragged/masked", out, _reference_loss(mo, lb, mk))

    # 4) single tile with an odd sublane count (H*W = 1296 -> S = 11, fold = 1 path)
    k1, k2, k3 = jax.random.split(jax.random.PRNGKey(3), 3)
    H, W = 36, 36
    mo = jax.random.normal(k1, (B, C, H, W), dtype=jnp.float32)
    lb = jax.random.randint(k2, (B, H, W), 0, C, dtype=jnp.int32)
    mk = (jax.random.uniform(k3, (B, H, W)) > 0.5).astype(jnp.float32)
    out = co_training_loss(mo, lb, mk)
    jax.block_until_ready(out)
    _check("odd-s/masked", out, _reference_loss(mo, lb, mk))

    print("KERNEL_OK")
</pallas_src>

<mosaic_0001>
module attributes {stable_mosaic.version = 11 : i64} {
  func.func @_loss_kernel(%arg0: i32, %arg1: i32, %arg2: memref<1x4x2x128xf32, #tpu.memory_space<vmem>>, %arg3: memref<1x2x128xi32, #tpu.memory_space<vmem>>, %arg4: memref<1x13x1xf32, #tpu.memory_space<vmem>>, %arg5: memref<13x2x128xf32, #tpu.memory_space<vmem>>) attributes {dimension_semantics = [#tpu.dimension_semantics<parallel>, #tpu.dimension_semantics<arbitrary>], iteration_bounds = array<i64: 2, 1>, scalar_prefetch = 0 : i64, scratch_operands = 1 : i64, tpu.core_type = #tpu.core_type<tc>, window_params = [{transform_indices = @transform_0, window_bounds = array<i64: 1, 4, 2, 128>}, {transform_indices = @transform_1, window_bounds = array<i64: 1, 2, 128>}, {transform_indices = @transform_2, window_bounds = array<i64: 1, 13, 1>}]} {
    %c0_i32 = arith.constant 0 : i32
    %0 = arith.cmpi eq, %arg1, %c0_i32 : i32
    %1 = arith.extui %0 : i1 to i32
    %c0_i32_0 = arith.constant 0 : i32
    %2 = arith.cmpi ne, %1, %c0_i32_0 : i32
    scf.if %2 {
      %cst_92 = arith.constant 0.000000e+00 : f32
      %149 = vector.broadcast %cst_92 : f32 to vector<13x2x128xf32>
      %c0_93 = arith.constant 0 : index
      %c0_94 = arith.constant 0 : index
      %c0_95 = arith.constant 0 : index
      %150 = vector.load %arg5[%c0_93, %c0_94, %c0_95] : memref<13x2x128xf32, #tpu.memory_space<vmem>>, vector<13x2x128xf32>
      tpu.vector_store %arg5[%c0_93, %c0_94, %c0_95], %149 {strides = array<i32>} : memref<13x2x128xf32, #tpu.memory_space<vmem>>, vector<13x2x128xf32>,
    } else {
    }
    %c0 = arith.constant 0 : index
    %c0_1 = arith.constant 0 : index
    %c0_2 = arith.constant 0 : index
    %3 = vector.load %arg3[%c0, %c0_1, %c0_2] : memref<1x2x128xi32, #tpu.memory_space<vmem>>, vector<1x2x128xi32>
    %4 = vector.shape_cast %3 : vector<1x2x128xi32> to vector<2x128xi32>
    %c0_3 = arith.constant 0 : index
    %c0_4 = arith.constant 0 : index
    %c0_5 = arith.constant 0 : index
    %c0_6 = arith.constant 0 : index
    %5 = vector.load %arg2[%c0_3, %c0_4, %c0_5, %c0_6] : memref<1x4x2x128xf32, #tpu.memory_space<vmem>>, vector<1x1x2x128xf32>
    %6 = vector.shape_cast %5 : vector<1x1x2x128xf32> to vector<2x128xf32>
    %c0_7 = arith.constant 0 : index
    %c1 = arith.constant 1 : index
    %c0_8 = arith.constant 0 : index
    %c0_9 = arith.constant 0 : index
    %7 = vector.load %arg2[%c0_7, %c1, %c0_8, %c0_9] : memref<1x4x2x128xf32, #tpu.memory_space<vmem>>, vector<1x1x2x128xf32>
    %8 = vector.shape_cast %7 : vector<1x1x2x128xf32> to vector<2x128xf32>
    %c0_10 = arith.constant 0 : index
    %c2 = arith.constant 2 : index
    %c0_11 = arith.constant 0 : index
    %c0_12 = arith.constant 0 : index
    %9 = vector.load %arg2[%c0_10, %c2, %c0_11, %c0_12] : memref<1x4x2x128xf32, #tpu.memory_space<vmem>>, vector<1x1x2x128xf32>
    %10 = vector.shape_cast %9 : vector<1x1x2x128xf32> to vector<2x128xf32>
    %c0_13 = arith.constant 0 : index
    %c3 = arith.constant 3 : index
    %c0_14 = arith.constant 0 : index
    %c0_15 = arith.constant 0 : index
    %11 = vector.load %arg2[%c0_13, %c3, %c0_14, %c0_15] : memref<1x4x2x128xf32, #tpu.memory_space<vmem>>, vector<1x1x2x128xf32>
    %12 = vector.shape_cast %11 : vector<1x1x2x128xf32> to vector<2x128xf32>
    %13 = arith.maximumf %6, %8 : vector<2x128xf32>
    %14 = arith.maximumf %13, %10 : vector<2x128xf32>
    %15 = arith.maximumf %14, %12 : vector<2x128xf32>
    %16 = arith.subf %6, %15 : vector<2x128xf32>
    %17 = math.exp %16 : vector<2x128xf32>
    %18 = arith.subf %8, %15 : vector<2x128xf32>
    %19 = math.exp %18 : vector<2x128xf32>
    %20 = arith.subf %10, %15 : vector<2x128xf32>
    %21 = math.exp %20 : vector<2x128xf32>
    %22 = arith.subf %12, %15 : vector<2x128xf32>
    %23 = math.exp %22 : vector<2x128xf32>
    %24 = arith.addf %17, %19 : vector<2x128xf32>
    %25 = arith.addf %24, %21 : vector<2x128xf32>
    %26 = arith.addf %25, %23 : vector<2x128xf32>
    %27 = tpu.reciprocal %26 {approx = true} : vector<2x128xf32> -> vector<2x128xf32>
    %28 = arith.mulf %17, %27 : vector<2x128xf32>
    %29 = arith.mulf %19, %27 : vector<2x128xf32>
    %30 = arith.mulf %21, %27 : vector<2x128xf32>
    %31 = arith.mulf %23, %27 : vector<2x128xf32>
    %c0_i32_16 = arith.constant 0 : i32
    %32 = vector.broadcast %c0_i32_16 : i32 to vector<2x128xi32>
    %33 = arith.cmpi eq, %4, %32 : vector<2x128xi32>
    %c1_i32 = arith.constant 1 : i32
    %34 = vector.broadcast %c1_i32 : i32 to vector<2x128xi32>
    %35 = arith.cmpi eq, %4, %34 : vector<2x128xi32>
    %c2_i32 = arith.constant 2 : i32
    %36 = vector.broadcast %c2_i32 : i32 to vector<2x128xi32>
    %37 = arith.cmpi eq, %4, %36 : vector<2x128xi32>
    %c3_i32 = arith.constant 3 : i32
    %38 = vector.broadcast %c3_i32 : i32 to vector<2x128xi32>
    %39 = arith.cmpi eq, %4, %38 : vector<2x128xi32>
    %cst = arith.constant 0.000000e+00 : f32
    %40 = vector.broadcast %cst : f32 to vector<2x128xf32>
    %41 = arith.select %33, %6, %40 : vector<2x128xi1>, vector<2x128xf32>
    %42 = arith.select %35, %8, %41 : vector<2x128xi1>, vector<2x128xf32>
    %43 = arith.select %37, %10, %42 : vector<2x128xi1>, vector<2x128xf32>
    %44 = arith.select %39, %12, %43 : vector<2x128xi1>, vector<2x128xf32>
    %45 = arith.subf %15, %44 : vector<2x128xf32>
    %46 = math.log %26 : vector<2x128xf32>
    %47 = arith.addf %45, %46 : vector<2x128xf32>
    %cst_17 = arith.constant 0.000000e+00 : f32
    %48 = vector.broadcast %cst_17 : f32 to vector<2x128xf32>
    %49 = arith.select %33, %28, %48 : vector<2x128xi1>, vector<2x128xf32>
    %50 = arith.extui %33 : vector<2x128xi1> to vector<2x128xi32>
    %51 = arith.sitofp %50 : vector<2x128xi32> to vector<2x128xf32>
    %52 = arith.mulf %28, %28 : vector<2x128xf32>
    %c0_18 = arith.constant 0 : index
    %c0_19 = arith.constant 0 : index
    %c0_20 = arith.constant 0 : index
    %53 = vector.load %arg5[%c0_18, %c0_19, %c0_20] : memref<13x2x128xf32, #tpu.memory_space<vmem>>, vector<1x2x128xf32>
    %54 = vector.shape_cast %53 : vector<1x2x128xf32> to vector<2x128xf32>
    %55 = arith.addf %54, %49 : vector<2x128xf32>
    %c0_21 = arith.constant 0 : index
    %c0_22 = arith.constant 0 : index
    %c0_23 = arith.constant 0 : index
    %56 = vector.load %arg5[%c0_21, %c0_22, %c0_23] : memref<13x2x128xf32, #tpu.memory_space<vmem>>, vector<1x2x128xf32>
    %57 = vector.shape_cast %56 : vector<1x2x128xf32> to vector<2x128xf32>
    %58 = vector.shape_cast %55 : vector<2x128xf32> to vector<1x2x128xf32>
    tpu.vector_store %arg5[%c0_21, %c0_22, %c0_23], %58 {strides = array<i32>} : memref<13x2x128xf32, #tpu.memory_space<vmem>>, vector<1x2x128xf32>,
    %c1_24 = arith.constant 1 : index
    %c0_25 = arith.constant 0 : index
    %c0_26 = arith.constant 0 : index
    %59 = vector.load %arg5[%c1_24, %c0_25, %c0_26] : memref<13x2x128xf32, #tpu.memory_space<vmem>>, vector<1x2x128xf32>
    %60 = vector.shape_cast %59 : vector<1x2x128xf32> to vector<2x128xf32>
    %61 = arith.addf %60, %51 : vector<2x128xf32>
    %c1_27 = arith.constant 1 : index
    %c0_28 = arith.constant 0 : index
    %c0_29 = arith.constant 0 : index
    %62 = vector.load %arg5[%c1_27, %c0_28, %c0_29] : memref<13x2x128xf32, #tpu.memory_space<vmem>>, vector<1x2x128xf32>
    %63 = vector.shape_cast %62 : vector<1x2x128xf32> to vector<2x128xf32>
    %64 = vector.shape_cast %61 : vector<2x128xf32> to vector<1x2x128xf32>
    tpu.vector_store %arg5[%c1_27, %c0_28, %c0_29], %64 {strides = array<i32>} : memref<13x2x128xf32, #tpu.memory_space<vmem>>, vector<1x2x128xf32>,
    %c2_30 = arith.constant 2 : index
    %c0_31 = arith.constant 0 : index
    %c0_32 = arith.constant 0 : index
    %65 = vector.load %arg5[%c2_30, %c0_31, %c0_32] : memref<13x2x128xf32, #tpu.memory_space<vmem>>, vector<1x2x128xf32>
    %66 = vector.shape_cast %65 : vector<1x2x128xf32> to vector<2x128xf32>
    %67 = arith.addf %66, %52 : vector<2x128xf32>
    %c2_33 = arith.constant 2 : index
    %c0_34 = arith.constant 0 : index
    %c0_35 = arith.constant 0 : index
    %68 = vector.load %arg5[%c2_33, %c0_34, %c0_35] : memref<13x2x128xf32, #tpu.memory_space<vmem>>, vector<1x2x128xf32>
    %69 = vector.shape_cast %68 : vector<1x2x128xf32> to vector<2x128xf32>
    %70 = vector.shape_cast %67 : vector<2x128xf32> to vector<1x2x128xf32>
    tpu.vector_store %arg5[%c2_33, %c0_34, %c0_35], %70 {strides = array<i32>} : memref<13x2x128xf32, #tpu.memory_space<vmem>>, vector<1x2x128xf32>,
    %cst_36 = arith.constant 0.000000e+00 : f32
    %71 = vector.broadcast %cst_36 : f32 to vector<2x128xf32>
    %72 = arith.select %35, %29, %71 : vector<2x128xi1>, vector<2x128xf32>
    %73 = arith.extui %35 : vector<2x128xi1> to vector<2x128xi32>
    %74 = arith.sitofp %73 : vector<2x128xi32> to vector<2x128xf32>
    %75 = arith.mulf %29, %29 : vector<2x128xf32>
    %c3_37 = arith.constant 3 : index
    %c0_38 = arith.constant 0 : index
    %c0_39 = arith.constant 0 : index
    %76 = vector.load %arg5[%c3_37, %c0_38, %c0_39] : memref<13x2x128xf32, #tpu.memory_space<vmem>>, vector<1x2x128xf32>
    %77 = vector.shape_cast %76 : vector<1x2x128xf32> to vector<2x128xf32>
    %78 = arith.addf %77, %72 : vector<2x128xf32>
    %c3_40 = arith.constant 3 : index
    %c0_41 = arith.constant 0 : index
    %c0_42 = arith.constant 0 : index
    %79 = vector.load %arg5[%c3_40, %c0_41, %c0_42] : memref<13x2x128xf32, #tpu.memory_space<vmem>>, vector<1x2x128xf32>
    %80 = vector.shape_cast %79 : vector<1x2x128xf32> to vector<2x128xf32>
    %81 = vector.shape_cast %78 : vector<2x128xf32> to vector<1x2x128xf32>
    tpu.vector_store %arg5[%c3_40, %c0_41, %c0_42], %81 {strides = array<i32>} : memref<13x2x128xf32, #tpu.memory_space<vmem>>, vector<1x2x128xf32>,
    %c4 = arith.constant 4 : index
    %c0_43 = arith.constant 0 : index
    %c0_44 = arith.constant 0 : index
    %82 = vector.load %arg5[%c4, %c0_43, %c0_44] : memref<13x2x128xf32, #tpu.memory_space<vmem>>, vector<1x2x128xf32>
    %83 = vector.shape_cast %82 : vector<1x2x128xf32> to vector<2x128xf32>
    %84 = arith.addf %83, %74 : vector<2x128xf32>
    %c4_45 = arith.constant 4 : index
    %c0_46 = arith.constant 0 : index
    %c0_47 = arith.constant 0 : index
    %85 = vector.load %arg5[%c4_45, %c0_46, %c0_47] : memref<13x2x128xf32, #tpu.memory_space<vmem>>, vector<1x2x128xf32>
    %86 = vector.shape_cast %85 : vector<1x2x128xf32> to vector<2x128xf32>
    %87 = vector.shape_cast %84 : vector<2x128xf32> to vector<1x2x128xf32>
    tpu.vector_store %arg5[%c4_45, %c0_46, %c0_47], %87 {strides = array<i32>} : memref<13x2x128xf32, #tpu.memory_space<vmem>>, vector<1x2x128xf32>,
    %c5 = arith.constant 5 : index
    %c0_48 = arith.constant 0 : index
    %c0_49 = arith.constant 0 : index
    %88 = vector.load %arg5[%c5, %c0_48, %c0_49] : memref<13x2x128xf32, #tpu.memory_space<vmem>>, vector<1x2x128xf32>
    %89 = vector.shape_cast %88 : vector<1x2x128xf32> to vector<2x128xf32>
    %90 = arith.addf %89, %75 : vector<2x128xf32>
    %c5_50 = arith.constant 5 : index
    %c0_51 = arith.constant 0 : index
    %c0_52 = arith.constant 0 : index
    %91 = vector.load %arg5[%c5_50, %c0_51, %c0_52] : memref<13x2x128xf32, #tpu.memory_space<vmem>>, vector<1x2x128xf32>
    %92 = vector.shape_cast %91 : vector<1x2x128xf32> to vector<2x128xf32>
    %93 = vector.shape_cast %90 : vector<2x128xf32> to vector<1x2x128xf32>
    tpu.vector_store %arg5[%c5_50, %c0_51, %c0_52], %93 {strides = array<i32>} : memref<13x2x128xf32, #tpu.memory_space<vmem>>, vector<1x2x128xf32>,
    %cst_53 = arith.constant 0.000000e+00 : f32
    %94 = vector.broadcast %cst_53 : f32 to vector<2x128xf32>
    %95 = arith.select %37, %30, %94 : vector<2x128xi1>, vector<2x128xf32>
    %96 = arith.extui %37 : vector<2x128xi1> to vector<2x128xi32>
    %97 = arith.sitofp %96 : vector<2x128xi32> to vector<2x128xf32>
    %98 = arith.mulf %30, %30 : vector<2x128xf32>
    %c6 = arith.constant 6 : index
    %c0_54 = arith.constant 0 : index
    %c0_55 = arith.constant 0 : index
    %99 = vector.load %arg5[%c6, %c0_54, %c0_55] : memref<13x2x128xf32, #tpu.memory_space<vmem>>, vector<1x2x128xf32>
    %100 = vector.shape_cast %99 : vector<1x2x128xf32> to vector<2x128xf32>
    %101 = arith.addf %100, %95 : vector<2x128xf32>
    %c6_56 = arith.constant 6 : index
    %c0_57 = arith.constant 0 : index
    %c0_58 = arith.constant 0 : index
    %102 = vector.load %arg5[%c6_56, %c0_57, %c0_58] : memref<13x2x128xf32, #tpu.memory_space<vmem>>, vector<1x2x128xf32>
    %103 = vector.shape_cast %102 : vector<1x2x128xf32> to vector<2x128xf32>
    %104 = vector.shape_cast %101 : vector<2x128xf32> to vector<1x2x128xf32>
    tpu.vector_store %arg5[%c6_56, %c0_57, %c0_58], %104 {strides = array<i32>} : memref<13x2x128xf32, #tpu.memory_space<vmem>>, vector<1x2x128xf32>,
    %c7 = arith.constant 7 : index
    %c0_59 = arith.constant 0 : index
    %c0_60 = arith.constant 0 : index
    %105 = vector.load %arg5[%c7, %c0_59, %c0_60] : memref<13x2x128xf32, #tpu.memory_space<vmem>>, vector<1x2x128xf32>
    %106 = vector.shape_cast %105 : vector<1x2x128xf32> to vector<2x128xf32>
    %107 = arith.addf %106, %97 : vector<2x128xf32>
    %c7_61 = arith.constant 7 : index
    %c0_62 = arith.constant 0 : index
    %c0_63 = arith.constant 0 : index
    %108 = vector.load %arg5[%c7_61, %c0_62, %c0_63] : memref<13x2x128xf32, #tpu.memory_space<vmem>>, vector<1x2x128xf32>
    %109 = vector.shape_cast %108 : vector<1x2x128xf32> to vector<2x128xf32>
    %110 = vector.shape_cast %107 : vector<2x128xf32> to vector<1x2x128xf32>
    tpu.vector_store %arg5[%c7_61, %c0_62, %c0_63], %110 {strides = array<i32>} : memref<13x2x128xf32, #tpu.memory_space<vmem>>, vector<1x2x128xf32>,
    %c8 = arith.constant 8 : index
    %c0_64 = arith.constant 0 : index
    %c0_65 = arith.constant 0 : index
    %111 = vector.load %arg5[%c8, %c0_64, %c0_65] : memref<13x2x128xf32, #tpu.memory_space<vmem>>, vector<1x2x128xf32>
    %112 = vector.shape_cast %111 : vector<1x2x128xf32> to vector<2x128xf32>
    %113 = arith.addf %112, %98 : vector<2x128xf32>
    %c8_66 = arith.constant 8 : index
    %c0_67 = arith.constant 0 : index
    %c0_68 = arith.constant 0 : index
    %114 = vector.load %arg5[%c8_66, %c0_67, %c0_68] : memref<13x2x128xf32, #tpu.memory_space<vmem>>, vector<1x2x128xf32>
    %115 = vector.shape_cast %114 : vector<1x2x128xf32> to vector<2x128xf32>
    %116 = vector.shape_cast %113 : vector<2x128xf32> to vector<1x2x128xf32>
    tpu.vector_store %arg5[%c8_66, %c0_67, %c0_68], %116 {strides = array<i32>} : memref<13x2x128xf32, #tpu.memory_space<vmem>>, vector<1x2x128xf32>,
    %cst_69 = arith.constant 0.000000e+00 : f32
    %117 = vector.broadcast %cst_69 : f32 to vector<2x128xf32>
    %118 = arith.select %39, %31, %117 : vector<2x128xi1>, vector<2x128xf32>
    %119 = arith.extui %39 : vector<2x128xi1> to vector<2x128xi32>
    %120 = arith.sitofp %119 : vector<2x128xi32> to vector<2x128xf32>
    %121 = arith.mulf %31, %31 : vector<2x128xf32>
    %c9 = arith.constant 9 : index
    %c0_70 = arith.constant 0 : index
    %c0_71 = arith.constant 0 : index
    %122 = vector.load %arg5[%c9, %c0_70, %c0_71] : memref<13x2x128xf32, #tpu.memory_space<vmem>>, vector<1x2x128xf32>
    %123 = vector.shape_cast %122 : vector<1x2x128xf32> to vector<2x128xf32>
    %124 = arith.addf %123, %118 : vector<2x128xf32>
    %c9_72 = arith.constant 9 : index
    %c0_73 = arith.constant 0 : index
    %c0_74 = arith.constant 0 : index
    %125 = vector.load %arg5[%c9_72, %c0_73, %c0_74] : memref<13x2x128xf32, #tpu.memory_space<vmem>>, vector<1x2x128xf32>
    %126 = vector.shape_cast %125 : vector<1x2x128xf32> to vector<2x128xf32>
    %127 = vector.shape_cast %124 : vector<2x128xf32> to vector<1x2x128xf32>
    tpu.vector_store %arg5[%c9_72, %c0_73, %c0_74], %127 {strides = array<i32>} : memref<13x2x128xf32, #tpu.memory_space<vmem>>, vector<1x2x128xf32>,
    %c10 = arith.constant 10 : index
    %c0_75 = arith.constant 0 : index
    %c0_76 = arith.constant 0 : index
    %128 = vector.load %arg5[%c10, %c0_75, %c0_76] : memref<13x2x128xf32, #tpu.memory_space<vmem>>, vector<1x2x128xf32>
    %129 = vector.shape_cast %128 : vector<1x2x128xf32> to vector<2x128xf32>
    %130 = arith.addf %129, %120 : vector<2x128xf32>
    %c10_77 = arith.constant 10 : index
    %c0_78 = arith.constant 0 : index
    %c0_79 = arith.constant 0 : index
    %131 = vector.load %arg5[%c10_77, %c0_78, %c0_79] : memref<13x2x128xf32, #tpu.memory_space<vmem>>, vector<1x2x128xf32>
    %132 = vector.shape_cast %131 : vector<1x2x128xf32> to vector<2x128xf32>
    %133 = vector.shape_cast %130 : vector<2x128xf32> to vector<1x2x128xf32>
    tpu.vector_store %arg5[%c10_77, %c0_78, %c0_79], %133 {strides = array<i32>} : memref<13x2x128xf32, #tpu.memory_space<vmem>>, vector<1x2x128xf32>,
    %c11 = arith.constant 11 : index
    %c0_80 = arith.constant 0 : index
    %c0_81 = arith.constant 0 : index
    %134 = vector.load %arg5[%c11, %c0_80, %c0_81] : memref<13x2x128xf32, #tpu.memory_space<vmem>>, vector<1x2x128xf32>
    %135 = vector.shape_cast %134 : vector<1x2x128xf32> to vector<2x128xf32>
    %136 = arith.addf %135, %121 : vector<2x128xf32>
    %c11_82 = arith.constant 11 : index
    %c0_83 = arith.constant 0 : index
    %c0_84 = arith.constant 0 : index
    %137 = vector.load %arg5[%c11_82, %c0_83, %c0_84] : memref<13x2x128xf32, #tpu.memory_space<vmem>>, vector<1x2x128xf32>
    %138 = vector.shape_cast %137 : vector<1x2x128xf32> to vector<2x128xf32>
    %139 = vector.shape_cast %136 : vector<2x128xf32> to vector<1x2x128xf32>
    tpu.vector_store %arg5[%c11_82, %c0_83, %c0_84], %139 {strides = array<i32>} : memref<13x2x128xf32, #tpu.memory_space<vmem>>, vector<1x2x128xf32>,
    %c12 = arith.constant 12 : index
    %c0_85 = arith.constant 0 : index
    %c0_86 = arith.constant 0 : index
    %140 = vector.load %arg5[%c12, %c0_85, %c0_86] : memref<13x2x128xf32, #tpu.memory_space<vmem>>, vector<1x2x128xf32>
    %141 = vector.shape_cast %140 : vector<1x2x128xf32> to vector<2x128xf32>
    %142 = arith.addf %141, %47 : vector<2x128xf32>
    %c12_87 = arith.constant 12 : index
    %c0_88 = arith.constant 0 : index
    %c0_89 = arith.constant 0 : index
    %143 = vector.load %arg5[%c12_87, %c0_88, %c0_89] : memref<13x2x128xf32, #tpu.memory_space<vmem>>, vector<1x2x128xf32>
    %144 = vector.shape_cast %143 : vector<1x2x128xf32> to vector<2x128xf32>
    %145 = vector.shape_cast %142 : vector<2x128xf32> to vector<1x2x128xf32>
    tpu.vector_store %arg5[%c12_87, %c0_88, %c0_89], %145 {strides = array<i32>} : memref<13x2x128xf32, #tpu.memory_space<vmem>>, vector<1x2x128xf32>,
    %c0_i32_90 = arith.constant 0 : i32
    %146 = arith.cmpi eq, %arg1, %c0_i32_90 : i32
    %147 = arith.extui %146 : i1 to i32
    %c0_i32_91 = arith.constant 0 : i32
    %148 = arith.cmpi ne, %147, %c0_i32_91 : i32
    scf.if %148 {
      %c0_92 = arith.constant 0 : index
      %c0_93 = arith.constant 0 : index
      %c0_94 = arith.constant 0 : index
      %149 = vector.load %arg5[%c0_92, %c0_93, %c0_94] : memref<13x2x128xf32, #tpu.memory_space<vmem>>, vector<13x2x128xf32>
      %cst_95 = arith.constant dense<0.000000e+00> : vector<13x2xf32>
      %150 = vector.multi_reduction <add>, %149, %cst_95 [2] : vector<13x2x128xf32> to vector<13x2xf32>
      %cst_96 = arith.constant dense<0.000000e+00> : vector<13xf32>
      %151 = vector.multi_reduction <add>, %150, %cst_96 [1] : vector<13x2xf32> to vector<13xf32>
      %152 = vector.shape_cast %151 : vector<13xf32> to vector<13x1xf32>
      %c0_97 = arith.constant 0 : index
      %c0_98 = arith.constant 0 : index
      %c0_99 = arith.constant 0 : index
      %153 = vector.load %arg4[%c0_97, %c0_98, %c0_99] : memref<1x13x1xf32, #tpu.memory_space<vmem>>, vector<1x13x1xf32>
      %154 = vector.shape_cast %153 : vector<1x13x1xf32> to vector<13x1xf32>
      %155 = vector.shape_cast %152 : vector<13x1xf32> to vector<1x13x1xf32>
      tpu.vector_store %arg4[%c0_97, %c0_98, %c0_99], %155 {strides = array<i32>} : memref<1x13x1xf32, #tpu.memory_space<vmem>>, vector<1x13x1xf32>,
    } else {
    }
    return
  }
  func.func @transform_0(%arg0: i32, %arg1: i32) -> (i32, i32, i32, i32) {
    %c0_i32 = arith.constant 0 : i32
    %c0_i32_0 = arith.constant 0 : i32
    %c0_i32_1 = arith.constant 0 : i32
    return %arg0, %c0_i32, %arg1, %c0_i32_0 : i32, i32, i32, i32
  }
  func.func @transform_1(%arg0: i32, %arg1: i32) -> (i32, i32, i32) {
    %c0_i32 = arith.constant 0 : i32
    %c0_i32_0 = arith.constant 0 : i32
    return %arg0, %arg1, %c0_i32 : i32, i32, i32
  }
  func.func @transform_2(%arg0: i32, %arg1: i32) -> (i32, i32, i32) {
    %c0_i32 = arith.constant 0 : i32
    %c0_i32_0 = arith.constant 0 : i32
    %c0_i32_1 = arith.constant 0 : i32
    return %arg0, %c0_i32, %c0_i32_0 : i32, i32, i32
  }
}

</mosaic_0001>

<bundles_post_ra>
// kernel: _co_training_loss_impl.1
= control target key start
LH: loop header
LB: loop body
LE: loop exit
PB: predicated region body
PF: predicated region fallthrough
CT: control target
= control target key end

     0   :  { %s659_s9 = smov 0   ;;  %s661_s10 = smov 0   ;;  %s755_s0 = inlined_call_operand.vmem [shape: f32[2,4,2,128], index: 0, kind: input, shape index: {}]   ;;  %s756_s1 = inlined_call_operand.vmem [shape: s32[2,2,128], index: 1, kind: input, shape index: {}]   ;;  %s757_s2 = inlined_call_operand.vmem [shape: f32[2,13,1], index: 2, kind: output, shape index: {}]  }
   0x1   :  { %s663_s11 = smov 0  }
   0x2 LB: > { %s24_s12 = sadd.s32 1, %s637_s10  ;;  %p565_p0 = scmp.ge.s32.totalorder %s641_s11, 1  ;;  %s641_s11 = sphi %s663_s11, %s12_s11   ;;  %s637_s10 = sphi %s661_s10, %s759_s10   ;;  %s633_s9 = sphi %s659_s9, %s758_s9  }
   0x3   : > { %p26_p1 = scmp.ge.s32.totalorder %s24_s12, 2  ;;  %p143_p2 = scmp.lt.s32.totalorder %s641_s11, 3 }
   0x5   : > { %s761_s12 = smov (%p26_p1, %s24_s12), 0  ;;  %p144_p3 = pnand %p565_p0, %p143_p2 }
   0x6   : > { %p175_p4 = scmp.lt.s32.totalorder (!%p144_p3), %s633_s9, 1 }
   0x7   : > { %147 = sbr.rel (%p144_p3) target bundleno = 379 (0x17b), region = 28 }
   0xc   : > { %v643_v0 = vmov 0.0   ;;  %s763_s9 = smov (!%p175_p4, %s633_s9), 1  ;;  %vm338_vm4 = vcmask 1041408   ;;  %vm445_vm5 = vcmask 1041409   ;;  %vm447_vm6 = vcmask 1042434  }
   0xd   : > { %200 = vst [vmem:[#allocation2 + $0x2] sm:$0x3] %v643_v0  ;;  %199 = vst [vmem:[#allocation2] sm:$0x3] %v643_v0  ;;  %s568_s13 = sshll.u32 %s763_s9, 1  ;;  %s580_s14 = sshll.u32 %s763_s9, 3 }
   0xe   : > { %201 = vst [vmem:[#allocation2 + $0x4] sm:$0x3] %v643_v0  ;;  %202 = vst [vmem:[#allocation2 + $0x6] sm:$0x3] %v643_v0  ;;  %s189_s17 = scalar_lea.vmem %s756_s1, %s568_s13  ;;  %s182_s20 = scalar_lea.vmem %s755_s0, %s580_s14  ;;  %vm449_vm7 = vcmask 1043459   ;;  %vm451_vm8 = vcmask 1044484  }
   0xf   : > { %203 = vst [vmem:[#allocation2 + $0x8] sm:$0x3] %v643_v0  ;;  %204 = vst [vmem:[#allocation2 + $0xa] sm:$0x3] %v643_v0  ;;  %v688_v1 = vld [vmem:[%s189_s17] sm:$0x3] }
  0x10   : > { %205 = vst [vmem:[#allocation2 + $0xc] sm:$0x3] %v643_v0  ;;  %206 = vst [vmem:[#allocation2 + $0xe] sm:$0x3] %v643_v0  ;;  %v213_v2 = vld [vmem:[%s182_s20] sm:$0x3] }
  0x11   : > { %207 = vst [vmem:[#allocation2 + $0x10] sm:$0x3] %v643_v0  ;;  %208 = vst [vmem:[#allocation2 + $0x12] sm:$0x3] %v643_v0  ;;  %vm243_vm0 = vcmp.eq.s32.totalorder %v688_v1, 0  ;;  %vm244_vm1 = vcmp.eq.s32.totalorder %v688_v1, 1 }
  0x12   : > { %209 = vst [vmem:[#allocation2 + $0x14] sm:$0x3] %v643_v0  ;;  %210 = vst [vmem:[#allocation2 + $0x16] sm:$0x3] %v643_v0  ;;  %v571_v3 = vld [vmem:[%s182_s20 + $0x2] sm:$0x3] }
  0x13   : > { %211 = vst [vmem:[#allocation2 + $0x18] sm:$0x3] %v643_v0  ;;  %v572_v4 = vld [vmem:[%s182_s20 + $0x4] sm:$0x3]  ;;  %v574_v5 = vsel %vm243_vm0, 1.0, %v643_v0  ;;  %v575_v8 = vsel %vm244_vm1, 1.0, %v643_v0  ;;  %v220_v9 = vmax.f32 %v213_v2, %v571_v3 }
  0x14   : > { %v263_v6 = vld [vmem:[#allocation2 + $0x2] sm:$0x3]  ;;  %v573_v7 = vld [vmem:[%s182_s20 + $0x6] sm:$0x3]  ;;  %vm246_vm2 = vcmp.eq.s32.totalorder %v688_v1, 3  ;;  %vm245_vm3 = vcmp.eq.s32.totalorder %v688_v1, 2 }
  0x15   : > { %v264_v10 = vadd.f32 %v574_v5, %v263_v6  ;;  %v221_v14 = vmax.f32 %v220_v9, %v572_v4  ;;  %v577_v15 = vsel %vm246_vm2, 1.0, %v643_v0  ;;  %v576_v18 = vsel %vm245_vm3, 1.0, %v643_v0  ;;  %v275_v47 = vld [vmem:[#allocation2 + $0x6] sm:$0x3]  ;;  %v259_v52 = vld [vmem:[#allocation2] sm:$0x3] }
  0x16   : > { %v279_v11 = vld [vmem:[#allocation2 + $0x8] sm:$0x3]  ;;  %v247_v42 = vsel %vm243_vm0, %v213_v2, 0.0  ;;  %v267_v62 = vld [vmem:[#allocation2 + $0x4] sm:$0x3]  ;;  %vm469_vm9 = vcmask 12288  }
  0x17   : > { %v280_v13 = vadd.f32 %v575_v8, %v279_v11  ;;  %265 = vst [vmem:[#allocation2 + $0x2] sm:$0x3] %v264_v10  ;;  %v699_v17 = vmax.f32 %v221_v14, %v573_v7  ;;  %v295_v19 = vld [vmem:[#allocation2 + $0xe] sm:$0x3]  ;;  %v248_v43 = vsel %vm244_vm1, %v571_v3, %v247_v42  ;;  %v291_v54 = vld [vmem:[#allocation2 + $0xc] sm:$0x3] }
  0x18   : > { %v296_v24 = vadd.f32 %v576_v18, %v295_v19  ;;  %v249_v44 = vsel %vm245_vm3, %v572_v4, %v248_v43  ;;  %v307_v56 = vld [vmem:[#allocation2 + $0x12] sm:$0x3]  ;;  %v299_v5 = vld [vmem:[#allocation2 + $0x10] sm:$0x3]  ;;  %v283_v11 = vld [vmem:[#allocation2 + $0xa] sm:$0x3] }
  0x19   : > { %v311_v12 = vld [vmem:[#allocation2 + $0x14] sm:$0x3]  ;;  %281 = vst [vmem:[#allocation2 + $0x8] sm:$0x3] %v280_v13  ;;  %v223_v20 = vsub.f32 %v213_v2, %v699_v17  ;;  %v226_v21 = vsub.f32 %v571_v3, %v699_v17  ;;  %v229_v22 = vsub.f32 %v572_v4, %v699_v17  ;;  %v232_v23 = vsub.f32 %v573_v7, %v699_v17  ;;  %v315_v4 = vld [vmem:[#allocation2 + $0x16] sm:$0x3] }
  0x1a   : > { %v312_v16 = vadd.f32 %v577_v15, %v311_v12  ;;  %297 = vst [vmem:[#allocation2 + $0xe] sm:$0x3] %v296_v24  ;;  %v250_v45 = vsel %vm246_vm2, %v573_v7, %v249_v44  ;;  %v319_v6 = vld [vmem:[#allocation2 + $0x18] sm:$0x3]  ;;  %vm453_vm10 = vcmask 1045509   ;;  %vm455_vm11 = vcmask 1046534  }
  0x1b   : > { %v224_v25 = vmul.f32 1.442695, %v223_v20  ;;  %v227_v26 = vmul.f32 1.442695, %v226_v21  ;;  %v230_v27 = vmul.f32 1.442695, %v229_v22  ;;  %v251_v48 = vsub.f32 %v699_v17, %v250_v45 }
  0x1c   : > { %313 = vst [vmem:[#allocation2 + $0x14] sm:$0x3] %v312_v16  ;;  %v233_v28 = vmul.f32 1.442695, %v232_v23  ;;  %vm457_vm12 = vcmask 1047559   ;;  %vm465_vm13 = vcmask 15360  }
  0x1d   : > { %607 = vpow2.f32 %v224_v25  ;;  %s581_s21 = sshll.u32 %s763_s9, 4  ;;  %vm475_vm14 = vcmask 4096   ;;  %vm473_vm15 = vcmask 7168  }
  0x1e   : > { %v326_v29 = vld [vmem:[#allocation2 + $0x2] sm:$0x3]  ;;  %609 = vpow2.f32 %v227_v26  ;;  %s194_s24 = scalar_lea.vmem %s757_s2, %s581_s21 }
  0x1f   : > { %v342_v30 = vsel %vm338_vm4, %v326_v29, 0.0  ;;  %611 = vpow2.f32 %v230_v27 }
  0x20   : > { %v329_v31 = vld [vmem:[#allocation2 + $0x8] sm:$0x3]  ;;  %343 = vadd.xlane.f32.xlu0 %v342_v30  ;;  %613 = vpow2.f32 %v233_v28 }
  0x21   : > { %v351_v32 = vsel %vm338_vm4, %v329_v31, 0.0 }
  0x23   : > { %v335_v33 = vld [vmem:[#allocation2 + $0x14] sm:$0x3] }
  0x24   : > { %352 = vadd.xlane.f32.xlu0 %v351_v32  ;;  %v369_v34 = vsel %vm338_vm4, %v335_v33, 0.0 }
  0x28   : > { %370 = vadd.xlane.f32.xlu0 %v369_v34 }
  0x2a   : > { %v608_v35 = vpop.eup %607 }
  0x2b   : > { %v610_v36 = vpop.eup %609 }
  0x2c   : > { %v612_v37 = vpop.eup %611  ;;  %v235_v38 = vadd.f32 %v610_v36, %v608_v35 }
  0x2d   : > { %v614_v39 = vpop.eup %613 }
  0x2e   : > { %v236_v40 = vadd.f32 %v612_v37, %v235_v38 }
  0x30   : > { %v237_v41 = vadd.f32 %v614_v39, %v236_v40  ;;  %v391_v40 = vlaneseq }
  0x32   : > { %615 = vrcp.f32 %v237_v41  ;;  %v392_v43 = vand.u32 127, %v391_v40  ;;  %v394_v44 = vshrl.u32 %v391_v40, 7 }
  0x33   : > { %617 = vlog2.f32 %v237_v41 }
  0x3f   : > { %v616_v46 = vpop.eup %615 }
  0x40   : > { %v618_v49 = vpop.eup %617  ;;  %v240_v50 = vmul.f32 %v616_v46, %v610_v36  ;;  %v239_v51 = vmul.f32 %v616_v46, %v608_v35  ;;  %v241_v53 = vmul.f32 %v616_v46, %v612_v37  ;;  %v242_v55 = vmul.f32 %v616_v46, %v614_v39  ;;  %v332_v35 = vld [vmem:[#allocation2 + $0xe] sm:$0x3] }
  0x41   : > { %v253_v57 = vmul.f32 0.6931472, %v618_v49  ;;  %v360_v36 = vsel %vm338_vm4, %v332_v35, 0.0 }
  0x42   : > { %v270_v58 = vsel %vm244_vm1, %v240_v50, 0.0  ;;  %v255_v59 = vsel %vm243_vm0, %v239_v51, 0.0  ;;  %v286_v60 = vsel %vm245_vm3, %v241_v53, 0.0  ;;  %v302_v61 = vsel %vm246_vm2, %v242_v55, 0.0 }
  0x43   : > { %v276_v63 = vadd.f32 %v275_v47, %v270_v58  ;;  %v260_v0 = vadd.f32 %v259_v52, %v255_v59  ;;  %v292_v2 = vadd.f32 %v291_v54, %v286_v60  ;;  %v308_v3 = vadd.f32 %v307_v56, %v302_v61 }
  0x44   : > { %v258_v7 = vmul.f32 %v239_v51, %v239_v51  ;;  %v305_v8 = vmul.f32 %v242_v55, %v242_v55  ;;  %v289_v9 = vmul.f32 %v241_v53, %v241_v53  ;;  %v254_v10 = vadd.f32 %v253_v57, %v251_v48 }
  0x45   : > { %277 = vst [vmem:[#allocation2 + $0x6] sm:$0x3] %v276_v63  ;;  %261 = vst [vmem:[#allocation2] sm:$0x3] %v260_v0  ;;  %v273_v12 = vmul.f32 %v240_v50, %v240_v50  ;;  %v395_v47 = vsub.s32 %v392_v43, %v394_v44 }
  0x46   : > { %293 = vst [vmem:[#allocation2 + $0xc] sm:$0x3] %v292_v2  ;;  %309 = vst [vmem:[#allocation2 + $0x12] sm:$0x3] %v308_v3  ;;  %v268_v1 = vadd.f32 %v267_v62, %v258_v7  ;;  %v316_v13 = vadd.f32 %v315_v4, %v305_v8  ;;  %v300_v14 = vadd.f32 %v299_v5, %v289_v9 }
  0x47   : > { %v320_v15 = vadd.f32 %v319_v6, %v254_v10  ;;  %v284_v16 = vadd.f32 %v283_v11, %v273_v12 }
  0x48   : > { %269 = vst [vmem:[#allocation2 + $0x4] sm:$0x3] %v268_v1  ;;  %317 = vst [vmem:[#allocation2 + $0x16] sm:$0x3] %v316_v13 }
  0x49   : > { %301 = vst [vmem:[#allocation2 + $0x10] sm:$0x3] %v300_v14  ;;  %321 = vst [vmem:[#allocation2 + $0x18] sm:$0x3] %v320_v15 }
  0x4a   : > { %285 = vst [vmem:[#allocation2 + $0xa] sm:$0x3] %v284_v16 }
  0x4c   : > { %v328_v17 = vld [vmem:[#allocation2 + $0x6] sm:$0x3]  ;;  %v325_v18 = vld [vmem:[#allocation2] sm:$0x3] }
  0x4d   : > { %v331_v19 = vld [vmem:[#allocation2 + $0xc] sm:$0x3]  ;;  %v348_v20 = vsel %vm338_vm4, %v328_v17, 0.0  ;;  %v339_v21 = vsel %vm338_vm4, %v325_v18, 0.0  ;;  %v334_v22 = vld [vmem:[#allocation2 + $0x12] sm:$0x3] }
  0x4e   : > { %349 = vadd.xlane.f32.xlu1 %v348_v20  ;;  %340 = vadd.xlane.f32.xlu0 %v339_v21  ;;  %v357_v23 = vsel %vm338_vm4, %v331_v19, 0.0  ;;  %v366_v24 = vsel %vm338_vm4, %v334_v22, 0.0 }
  0x4f   : > { %v327_v25 = vld [vmem:[#allocation2 + $0x4] sm:$0x3]  ;;  %v336_v26 = vld [vmem:[#allocation2 + $0x16] sm:$0x3] }
  0x50   : > { %v345_v27 = vsel %vm338_vm4, %v327_v25, 0.0  ;;  %v372_v28 = vsel %vm338_vm4, %v336_v26, 0.0  ;;  %v333_v29 = vld [vmem:[#allocation2 + $0x10] sm:$0x3]  ;;  %v337_v30 = vld [vmem:[#allocation2 + $0x18] sm:$0x3] }
  0x51   : > { %v363_v31 = vsel %vm338_vm4, %v333_v29, 0.0  ;;  %v375_v32 = vsel %vm338_vm4, %v337_v30, 0.0  ;;  %v330_v33 = vld [vmem:[#allocation2 + $0xa] sm:$0x3] }
  0x52   : > { %358 = vadd.xlane.f32.xlu1 %v357_v23  ;;  %367 = vadd.xlane.f32.xlu0 %v366_v24  ;;  %v354_v34 = vsel %vm338_vm4, %v330_v33, 0.0 }
  0x56   : > { %346 = vadd.xlane.f32.xlu1 %v345_v27  ;;  %373 = vadd.xlane.f32.xlu0 %v372_v28 }
  0x5a   : > { %364 = vadd.xlane.f32.xlu1 %v363_v31  ;;  %376 = vadd.xlane.f32.xlu0 %v375_v32 }
  0x5e   : > { %355 = vadd.xlane.f32.xlu1 %v354_v34 }
  0x62   : > { %361 = vadd.xlane.f32.xlu1 %v360_v36 }
  0xa9   : > { %v344_v37 = vpop.xlane.xlu0 %343 }
  0xaa   : > { %v400_v51 = vrot.slane %v344_v37, %v395_v47 }
  0xad   : > { %v353_v38 = vpop.xlane.xlu0 %352 }
  0xae   : > { %v412_v2 = vrot.slane %v353_v38, %v395_v47 }
  0xb1   : > { %v371_v39 = vpop.xlane.xlu0 %370 }
  0xb2   : > { %v436_v61 = vrot.slane %v371_v39, %v395_v47 }
  0xd7   : > { %v350_v41 = vpop.xlane.xlu1 %349  ;;  %v341_v42 = vpop.xlane.xlu0 %340 }
  0xd8   : > { %v396_v48 = vrot.slane %v341_v42, %v395_v47  ;;  %v408_v58 = vrot.slane %v350_v41, %v395_v47 }
  0xda   : > { %v446_v53 = vsel %vm445_vm5, %v400_v51, %v396_v48 }
  0xdb   : > { %v359_v45 = vpop.xlane.xlu1 %358  ;;  %v368_v46 = vpop.xlane.xlu0 %367 }
  0xdc   : > { %v432_v54 = vrot.slane %v368_v46, %v395_v47  ;;  %v420_v11 = vrot.slane %v359_v45, %v395_v47 }
  0xdf   : > { %v347_v49 = vpop.xlane.xlu1 %346  ;;  %v374_v50 = vpop.xlane.xlu0 %373 }
  0xe0   : > { %v404_v52 = vrot.slane %v347_v49, %v395_v47  ;;  %v440_v59 = vrot.slane %v374_v50, %v395_v47 }
  0xe2   : > { %v448_v55 = vsel %vm447_vm6, %v404_v52, %v446_v53 }
  0xe3   : > { %v365_v56 = vpop.xlane.xlu1 %364  ;;  %v377_v57 = vpop.xlane.xlu0 %376  ;;  %v450_v0 = vsel %vm449_vm7, %v408_v58, %v448_v55 }
  0xe4   : > { %v428_v60 = vrot.slane %v365_v56, %v395_v47  ;;  %v444_v62 = vrot.slane %v377_v57, %v395_v47  ;;  %v452_v7 = vsel %vm451_vm8, %v412_v2, %v450_v0 }
  0xe6   : > { %v459_v63 = vsel %vm445_vm5, %v432_v54, %v428_v60 }
  0xe7   : > { %v356_v3 = vpop.xlane.xlu1 %355  ;;  %v460_v4 = vsel %vm447_vm6, %v436_v61, %v459_v63 }
  0xe8   : > { %v416_v5 = vrot.slane %v356_v3, %v395_v47  ;;  %v461_v6 = vsel %vm449_vm7, %v440_v59, %v460_v4 }
  0xe9   : > { %v462_v8 = vsel %vm451_vm8, %v444_v62, %v461_v6 }
  0xea   : > { %v470_v9 = vsel %vm469_vm9, %v462_v8, 0.0  ;;  %v454_v10 = vsel %vm453_vm10, %v416_v5, %v452_v7 }
  0xeb   : > { %v362_v12 = vpop.xlane.xlu1 %361  ;;  %471 = vadd.xlane.f32.xlu0 %v470_v9  ;;  %v456_v13 = vsel %vm455_vm11, %v420_v11, %v454_v10 }
  0xec   : > { %v424_v1 = vrot.slane %v362_v12, %v395_v47 }
  0xee   : > { %v458_v14 = vsel %vm457_vm12, %v424_v1, %v456_v13 }
  0xef   : > { %v466_v15 = vsel %vm465_vm13, %v458_v14, 0.0 }
  0xf0   : > { %467 = vadd.xlane.f32.xlu1 %v466_v15 }
 0x174   : > { %v472_v16 = vpop.xlane.xlu0 %471 }
 0x175   : > { %476 = vst.msk [vmem:[%s194_s24 + $0x8] sm:$0x1f] %vm475_vm14, %v472_v16 }
 0x179   : > { %v468_v17 = vpop.xlane.xlu1 %467 }
 0x17a   : > { %474 = vst.msk [vmem:[%s194_s24] sm:$0xff] %vm473_vm15, %v468_v17 }
 0x17b PF: > { %s12_s11 = sadd.s32 1, %s641_s11   ;;  %s758_s9 = smov %s637_s10 }
 0x17c   : > { %p9_p5 = scmp.ge.s32.totalorder %s12_s11, 4   ;;  %s759_s10 = smov %s761_s12 }
 0x17e   :  { %11 = sbr.rel (!%p9_p5) target bundleno = 2 (0x2), region = 84 }

</bundles_post_ra>
